<compile_context>
chip_gen: v7x
topology: tpu7x:2x2x1
jax: 0.10.0
libtpu: 0.0.40
codegen_flags: <defaults>
</compile_context>

<pallas_src>
import jax
import jax.numpy as jnp
from jax import lax
from jax.experimental import pallas as pl
from jax.experimental.pallas import tpu as pltpu

HIDDEN = 128
_VMEM_LIMIT = 32 * 1024 * 1024


# ---------------- Pallas kernels ----------------

def _mlp_l2c_kernel(x_ref, w1_ref, b1_ref, w2_ref, b2_ref, o_ref):
    # per-literal MLP: (tl, INp) @ (INp, 128) -> ReLU -> (tl, 128) @ (128, CSp)
    h = jnp.dot(x_ref[...], w1_ref[...], preferred_element_type=jnp.float32) + b1_ref[...]
    h = jnp.maximum(h, 0.0).astype(w2_ref.dtype)
    o_ref[...] = (jnp.dot(h, w2_ref[...], preferred_element_type=jnp.float32)
                  + b2_ref[...]).astype(o_ref.dtype)


def _clause_stage_kernel(a_ref, wh_ref, cfeat_ref, w3a_ref, w3b_ref, b3_ref,
                         w4_ref, b4_ref, o_ref, acc_ref):
    # K-blocked sum-aggregation of literal messages into a clause tile, then the c2l MLP.
    k = pl.program_id(1)

    @pl.when(k == 0)
    def _init():
        acc_ref[...] = jnp.zeros_like(acc_ref)

    acc_ref[...] += jnp.dot(a_ref[...], wh_ref[...], preferred_element_type=jnp.float32)

    @pl.when(k == pl.num_programs(1) - 1)
    def _finish():
        cembs = jnp.maximum(acc_ref[...], 0.0).astype(w3a_ref.dtype)
        # concat([cembs, clause_feat], 1) @ W3  ==  cembs @ W3a + clause_feat @ W3b
        h = (jnp.dot(cembs, w3a_ref[...], preferred_element_type=jnp.float32)
             + jnp.dot(cfeat_ref[...], w3b_ref[...], preferred_element_type=jnp.float32)
             + b3_ref[...])
        h = jnp.maximum(h, 0.0).astype(w4_ref.dtype)
        o_ref[...] = (jnp.dot(h, w4_ref[...], preferred_element_type=jnp.float32)
                      + b4_ref[...]).astype(o_ref.dtype)


def _literal_stage_kernel(a_ref, wh_ref, o_ref, acc_ref):
    # K-blocked sum-aggregation of clause messages into a literal tile, then activation.
    # a_ref is a (tc, tl) strip of the UNtransposed adjacency; contract over axis 0
    # (A_blk^T @ Wh_blk) so no transposed copy of A is ever materialized in HBM.
    k = pl.program_id(1)

    @pl.when(k == 0)
    def _init():
        acc_ref[...] = jnp.zeros_like(acc_ref)

    acc_ref[...] += lax.dot_general(
        a_ref[...], wh_ref[...],
        dimension_numbers=(((0,), (0,)), ((), ())),
        preferred_element_type=jnp.float32)

    @pl.when(k == pl.num_programs(1) - 1)
    def _finish():
        o_ref[...] = jnp.maximum(acc_ref[...], 0.0).astype(o_ref.dtype)


# ---------------- Wrapper ----------------

def _round_up(x, m):
    return ((x + m - 1) // m) * m


def _pad2(x, rows, cols):
    return jnp.pad(x, ((0, rows - x.shape[0]), (0, cols - x.shape[1])))


def cnf_layer_forward(lit_feat, clause_feat, a_l2c, params, *, tl=256, tc=256):
    """lit_feat: (NL, in_size); clause_feat: (NC, clabel_dim); a_l2c: (NC, NL) 0/1."""
    assert tl % 128 == 0 and tc % 128 == 0, "row tiles must be multiples of 128"

    nl, in_size = lit_feat.shape
    nc, clabel_dim = clause_feat.shape
    w1, b1, w2, b2, w3a, w3b, b3, w4, b4 = (params[k] for k in
        ("w1", "b1", "w2", "b2", "w3a", "w3b", "b3", "w4", "b4"))
    clause_size = w2.shape[1]
    out_size = w4.shape[1]

    # Lane-dense padding of every feature dimension to a multiple of 128.
    in_p = _round_up(in_size, 128)
    cl_p = _round_up(clabel_dim, 128)
    cs_p = _round_up(clause_size, 128)
    os_p = _round_up(out_size, 128)
    nlp = _round_up(nl, tl)
    ncp = _round_up(nc, tc)

    bf = jnp.bfloat16
    f32 = jnp.float32

    lit_p = _pad2(lit_feat, nlp, in_p).astype(bf)
    clause_p = _pad2(clause_feat, ncp, cl_p).astype(bf)
    a_p = _pad2(a_l2c, ncp, nlp).astype(bf)          # 0/1 is exact in bf16

    w1p = _pad2(w1, in_p, HIDDEN).astype(bf)
    b1p = b1.astype(f32)
    w2p = _pad2(w2, HIDDEN, cs_p).astype(bf)
    b2p = _pad2(b2, 1, cs_p).astype(f32)
    w3ap = _pad2(w3a, cs_p, HIDDEN).astype(bf)
    w3bp = _pad2(w3b, cl_p, HIDDEN).astype(bf)
    b3p = b3.astype(f32)
    w4p = _pad2(w4, HIDDEN, os_p).astype(bf)
    b4p = _pad2(b4, 1, os_p).astype(f32)

    cp1 = pltpu.CompilerParams(dimension_semantics=("parallel",),
                               vmem_limit_bytes=_VMEM_LIMIT)
    cp2 = pltpu.CompilerParams(dimension_semantics=("parallel", "arbitrary"),
                               vmem_limit_bytes=_VMEM_LIMIT)

    # Stage 1: per-literal MLP (l2c weights), tiled over literals.
    wh_l2c = pl.pallas_call(
        _mlp_l2c_kernel,
        out_shape=jax.ShapeDtypeStruct((nlp, cs_p), bf),
        grid=(nlp // tl,),
        in_specs=[pl.BlockSpec((tl, in_p), lambda i: (i, 0)),
                  pl.BlockSpec((in_p, HIDDEN), lambda i: (0, 0)),
                  pl.BlockSpec((1, HIDDEN), lambda i: (0, 0)),
                  pl.BlockSpec((HIDDEN, cs_p), lambda i: (0, 0)),
                  pl.BlockSpec((1, cs_p), lambda i: (0, 0))],
        out_specs=pl.BlockSpec((tl, cs_p), lambda i: (i, 0)),
        compiler_params=cp1,
    )(lit_p, w1p, b1p, w2p, b2p)

    # Stage 2: K-blocked l2c sum-aggregation + activation + c2l MLP, tiled over clauses.
    wh_c2l = pl.pallas_call(
        _clause_stage_kernel,
        out_shape=jax.ShapeDtypeStruct((ncp, os_p), bf),
        grid=(ncp // tc, nlp // tl),
        in_specs=[pl.BlockSpec((tc, tl), lambda i, k: (i, k)),        # A_l2c strip
                  pl.BlockSpec((tl, cs_p), lambda i, k: (k, 0)),      # Wh_l2c K block
                  pl.BlockSpec((tc, cl_p), lambda i, k: (i, 0)),      # clause features
                  pl.BlockSpec((cs_p, HIDDEN), lambda i, k: (0, 0)),  # w3a
                  pl.BlockSpec((cl_p, HIDDEN), lambda i, k: (0, 0)),  # w3b
                  pl.BlockSpec((1, HIDDEN), lambda i, k: (0, 0)),     # b3
                  pl.BlockSpec((HIDDEN, os_p), lambda i, k: (0, 0)),  # w4
                  pl.BlockSpec((1, os_p), lambda i, k: (0, 0))],      # b4
        out_specs=pl.BlockSpec((tc, os_p), lambda i, k: (i, 0)),
        scratch_shapes=[pltpu.VMEM((tc, cs_p), jnp.float32)],
        compiler_params=cp2,
    )(a_p, wh_l2c, clause_p, w3ap, w3bp, b3p, w4p, b4p)

    # Stage 3: K-blocked c2l sum-aggregation + activation, tiled over literals.
    # Reads column strips of the same A (no transposed HBM copy).
    lembs_p = pl.pallas_call(
        _literal_stage_kernel,
        out_shape=jax.ShapeDtypeStruct((nlp, os_p), jnp.float32),
        grid=(nlp // tl, ncp // tc),
        in_specs=[pl.BlockSpec((tc, tl), lambda i, k: (k, i)),        # A_l2c column strip
                  pl.BlockSpec((tc, os_p), lambda i, k: (k, 0))],     # Wh_c2l K block
        out_specs=pl.BlockSpec((tl, os_p), lambda i, k: (i, 0)),
        scratch_shapes=[pltpu.VMEM((tl, os_p), jnp.float32)],
        compiler_params=cp2,
    )(a_p, wh_c2l)

    return lembs_p[:nl, :out_size]


# ---------------- References (pure JAX) ----------------

def cnf_layer_reference_f32(lit_feat, clause_feat, a_l2c, p):
    wh_l2c = jnp.maximum(lit_feat @ p["w1"] + p["b1"], 0.0) @ p["w2"] + p["b2"]
    cembs = jnp.maximum(a_l2c @ wh_l2c, 0.0)
    cat = jnp.concatenate([cembs, clause_feat], axis=1)
    w3 = jnp.concatenate([p["w3a"], p["w3b"]], axis=0)
    wh_c2l = jnp.maximum(cat @ w3 + p["b3"], 0.0) @ p["w4"] + p["b4"]
    return jnp.maximum(a_l2c.T @ wh_c2l, 0.0)


def cnf_layer_reference_mixed(lit_feat, clause_feat, a_l2c, p):
    # Mirrors the kernel's mixed precision (bf16 MXU operands, f32 accumulation).
    bf, f32 = jnp.bfloat16, jnp.float32

    def mm(a, b):
        return jnp.dot(a.astype(bf), b.astype(bf), preferred_element_type=f32)

    h = jnp.maximum(mm(lit_feat, p["w1"]) + p["b1"], 0.0)
    wh_l2c = (mm(h, p["w2"]) + p["b2"]).astype(bf)
    cembs = jnp.maximum(mm(a_l2c, wh_l2c), 0.0)
    h = jnp.maximum(mm(cembs, p["w3a"]) + mm(clause_feat, p["w3b"]) + p["b3"], 0.0)
    wh_c2l = (mm(h, p["w4"]) + p["b4"]).astype(bf)
    return jnp.maximum(mm(a_l2c.T, wh_c2l), 0.0)


# ---------------- Main ----------------

if __name__ == "__main__":
    key = jax.random.PRNGKey(0)
    ks = jax.random.split(key, 12)

    # Small CNF graph (multi-tile with the default 256-row tiles).
    NL, NC = 600, 400
    in_size, clause_size, clabel_dim, out_size = 8, 32, 4, 32

    lit_feat = jax.random.normal(ks[0], (NL, in_size), jnp.float32)
    clause_feat = jax.random.normal(ks[1], (NC, clabel_dim), jnp.float32)
    a_l2c = (jax.random.uniform(ks[2], (NC, NL)) < 0.15).astype(jnp.float32)

    scale = 0.1
    params = {
        "w1": scale * jax.random.normal(ks[3], (in_size, HIDDEN), jnp.float32),
        "b1": scale * jax.random.normal(ks[4], (1, HIDDEN), jnp.float32),
        "w2": scale * jax.random.normal(ks[5], (HIDDEN, clause_size), jnp.float32),
        "b2": scale * jax.random.normal(ks[6], (1, clause_size), jnp.float32),
        "w3a": scale * jax.random.normal(ks[7], (clause_size, HIDDEN), jnp.float32),
        "w3b": scale * jax.random.normal(ks[8], (clabel_dim, HIDDEN), jnp.float32),
        "b3": scale * jax.random.normal(ks[9], (1, HIDDEN), jnp.float32),
        "w4": scale * jax.random.normal(ks[10], (HIDDEN, out_size), jnp.float32),
        "b4": scale * jax.random.normal(ks[11], (1, out_size), jnp.float32),
    }

    lembs = cnf_layer_forward(lit_feat, clause_feat, a_l2c, params)
    lembs = jax.block_until_ready(lembs)
    assert lembs.shape == (NL, out_size)

    # Exact-math check against a mixed-precision (bf16 operands / f32 accumulate) reference.
    ref_mixed = cnf_layer_reference_mixed(lit_feat, clause_feat, a_l2c, params)
    assert jnp.allclose(lembs, ref_mixed, atol=5e-2, rtol=2e-2), "mismatch vs mixed-precision reference"

    # Semantics check against the pure-f32 reference (within bf16 precision).
    ref_f32 = cnf_layer_reference_f32(lit_feat, clause_feat, a_l2c, params)
    rel_err = float(jnp.max(jnp.abs(lembs - ref_f32)) / (jnp.max(jnp.abs(ref_f32)) + 1e-6))
    assert rel_err < 0.05, f"normalized error vs f32 reference too large: {rel_err}"

    print("KERNEL_OK")
</pallas_src>

<mosaic_0001>
module attributes {stable_mosaic.version = 11 : i64} {
  func.func @_mlp_l2c_kernel(%arg0: i32, %arg1: memref<256x128xbf16, #tpu.memory_space<vmem>>, %arg2: memref<128x128xbf16, #tpu.memory_space<vmem>>, %arg3: memref<1x128xf32, #tpu.memory_space<vmem>>, %arg4: memref<128x128xbf16, #tpu.memory_space<vmem>>, %arg5: memref<1x128xf32, #tpu.memory_space<vmem>>, %arg6: memref<256x128xbf16, #tpu.memory_space<vmem>>) attributes {dimension_semantics = [#tpu.dimension_semantics<parallel>], iteration_bounds = array<i64: 3>, scalar_prefetch = 0 : i64, scratch_operands = 0 : i64, tpu.core_type = #tpu.core_type<tc>, window_params = [{transform_indices = @transform_0, window_bounds = array<i64: 256, 128>}, {pipeline_mode = #tpu.pipeline_mode<synchronous>, transform_indices = @transform_1, window_bounds = array<i64: 128, 128>}, {pipeline_mode = #tpu.pipeline_mode<synchronous>, transform_indices = @transform_2, window_bounds = array<i64: 1, 128>}, {pipeline_mode = #tpu.pipeline_mode<synchronous>, transform_indices = @transform_3, window_bounds = array<i64: 128, 128>}, {pipeline_mode = #tpu.pipeline_mode<synchronous>, transform_indices = @transform_4, window_bounds = array<i64: 1, 128>}, {transform_indices = @transform_5, window_bounds = array<i64: 256, 128>}]} {
    %c0 = arith.constant 0 : index
    %c0_0 = arith.constant 0 : index
    %0 = vector.load %arg1[%c0, %c0_0] : memref<256x128xbf16, #tpu.memory_space<vmem>>, vector<256x128xbf16>
    %c0_1 = arith.constant 0 : index
    %c0_2 = arith.constant 0 : index
    %1 = vector.load %arg2[%c0_1, %c0_2] : memref<128x128xbf16, #tpu.memory_space<vmem>>, vector<128x128xbf16>
    %cst = arith.constant dense<0.000000e+00> : vector<256x128xf32>
    %2 = tpu.matmul %0, %1, %cst {dimension_numbers = #tpu.dot_dimension_numbers<[1], [0], [0], [1], [0, 0, 1, 1], [], []>} : vector<256x128xbf16>, vector<128x128xbf16>, vector<256x128xf32> -> vector<256x128xf32>
    %c0_3 = arith.constant 0 : index
    %c0_4 = arith.constant 0 : index
    %3 = vector.load %arg3[%c0_3, %c0_4] : memref<1x128xf32, #tpu.memory_space<vmem>>, vector<1x128xf32>
    %4 = vector.broadcast %3 : vector<1x128xf32> to vector<256x128xf32>
    %5 = arith.addf %2, %4 : vector<256x128xf32>
    %cst_5 = arith.constant 0.000000e+00 : f32
    %6 = vector.broadcast %cst_5 : f32 to vector<256x128xf32>
    %7 = arith.maximumf %5, %6 : vector<256x128xf32>
    %8 = arith.truncf %7 : vector<256x128xf32> to vector<256x128xbf16>
    %c0_6 = arith.constant 0 : index
    %c0_7 = arith.constant 0 : index
    %9 = vector.load %arg4[%c0_6, %c0_7] : memref<128x128xbf16, #tpu.memory_space<vmem>>, vector<128x128xbf16>
    %cst_8 = arith.constant dense<0.000000e+00> : vector<256x128xf32>
    %10 = tpu.matmul %8, %9, %cst_8 {dimension_numbers = #tpu.dot_dimension_numbers<[1], [0], [0], [1], [0, 0, 1, 1], [], []>} : vector<256x128xbf16>, vector<128x128xbf16>, vector<256x128xf32> -> vector<256x128xf32>
    %c0_9 = arith.constant 0 : index
    %c0_10 = arith.constant 0 : index
    %11 = vector.load %arg5[%c0_9, %c0_10] : memref<1x128xf32, #tpu.memory_space<vmem>>, vector<1x128xf32>
    %12 = vector.broadcast %11 : vector<1x128xf32> to vector<256x128xf32>
    %13 = arith.addf %10, %12 : vector<256x128xf32>
    %14 = arith.truncf %13 : vector<256x128xf32> to vector<256x128xbf16>
    %c0_11 = arith.constant 0 : index
    %c0_12 = arith.constant 0 : index
    %15 = vector.load %arg6[%c0_11, %c0_12] : memref<256x128xbf16, #tpu.memory_space<vmem>>, vector<256x128xbf16>
    tpu.vector_store %arg6[%c0_11, %c0_12], %14 {strides = array<i32>} : memref<256x128xbf16, #tpu.memory_space<vmem>>, vector<256x128xbf16>,
    return
  }
  func.func @transform_0(%arg0: i32) -> (i32, i32) {
    %c0_i32 = arith.constant 0 : i32
    %c0_i32_0 = arith.constant 0 : i32
    return %arg0, %c0_i32 : i32, i32
  }
  func.func @transform_1(%arg0: i32) -> (i32, i32) {
    %c0_i32 = arith.constant 0 : i32
    %c0_i32_0 = arith.constant 0 : i32
    %c0_i32_1 = arith.constant 0 : i32
    return %c0_i32, %c0_i32_0 : i32, i32
  }
  func.func @transform_2(%arg0: i32) -> (i32, i32) {
    %c0_i32 = arith.constant 0 : i32
    %c0_i32_0 = arith.constant 0 : i32
    %c0_i32_1 = arith.constant 0 : i32
    return %c0_i32, %c0_i32_0 : i32, i32
  }
  func.func @transform_3(%arg0: i32) -> (i32, i32) {
    %c0_i32 = arith.constant 0 : i32
    %c0_i32_0 = arith.constant 0 : i32
    %c0_i32_1 = arith.constant 0 : i32
    return %c0_i32, %c0_i32_0 : i32, i32
  }
  func.func @transform_4(%arg0: i32) -> (i32, i32) {
    %c0_i32 = arith.constant 0 : i32
    %c0_i32_0 = arith.constant 0 : i32
    %c0_i32_1 = arith.constant 0 : i32
    return %c0_i32, %c0_i32_0 : i32, i32
  }
  func.func @transform_5(%arg0: i32) -> (i32, i32) {
    %c0_i32 = arith.constant 0 : i32
    %c0_i32_0 = arith.constant 0 : i32
    return %arg0, %c0_i32 : i32, i32
  }
}

</mosaic_0001>

<bundles_post_ra>
// kernel: tpu_custom_call.1
= control target key start
LH: loop header
LB: loop body
LE: loop exit
PB: predicated region body
PF: predicated region fallthrough
CT: control target
= control target key end

     0   :  { %10 = vsyncpa [#allocation3], 0  ;;  %s2186_s0 = inlined_call_operand.hbm [shape: bf16[768,128], index: 0, kind: input, shape index: {}]   ;;  %s2187_s1 = inlined_call_operand.hbm [shape: bf16[128,128], index: 1, kind: input, shape index: {}]   ;;  %s2188_s2 = inlined_call_operand.vmem [shape: f32[1,128], index: 2, kind: input, shape index: {}]   ;;  %s2189_s3 = inlined_call_operand.hbm [shape: bf16[128,128], index: 3, kind: input, shape index: {}]   ;;  %s2190_s4 = inlined_call_operand.vmem [shape: f32[1,128], index: 4, kind: input, shape index: {}]   ;;  %s2191_s5 = inlined_call_operand.hbm [shape: bf16[768,128], index: 5, kind: output, shape index: {}]  }
   0x1   :  { %12 = vsyncpa [#allocation3 + $0x1], 0 }
   0x2   :  { %13 = vsyncpa [#allocation6], 0 }
   0x3   :  { %14 = vsyncpa [#allocation4], 0 }
   0x4   :  { %16 = vsyncpa [#allocation4 + $0x1], 0  ;;  %s1837_s18 = smov 0   ;;  %s1839_s19 = smov 0  }
   0x5   :  { %s1841_s20 = smov 0   ;;  %s1843_s21 = smov 0  }
   0x6 LB: > { %s1858_s22 = sadd.s32 4294967295, %s1797_s21   ;;  %s1181_s23 = sadd.s32 4294967294, %s1797_s21   ;;  %s1797_s21 = sphi %s1843_s21, %s2210_s21   ;;  %s1793_s20 = sphi %s1841_s20, %s2209_s20   ;;  %s1789_s19 = sphi %s1839_s19, %s2208_s19   ;;  %s1785_s18 = sphi %s1837_s18, %s2207_s18  }
   0x7   : > { %p42_p0 = scmp.ne.s32.totalorder %s1789_s19, %s1785_s18  ;;  %p2192_p1 = scmp.eq.s32.totalorder %s1858_s22, 0 }
   0x8   : > { %p156_p3 = scmp.eq.s32.totalorder %s1181_s23, 2  ;;  %p1182_p5 = scmp.ge.s32.totalorder %s1797_s21, 1 }
   0x9   : > { %p1867_p4 = por %p2192_p1, %p42_p0  ;;  %p163_p7 = scmp.lt.s32.totalorder %s1797_s21, 4 }
   0xa   : > { %p1872_p6 = por %p156_p3, %p42_p0  ;;  %s1799_s27 = smov [#allocation5]  }
   0xb   : > { %s2195_s24 = scalar_select %p1867_p4, 1, 0 }
   0xc   : > { %s2196_s25 = scalar_select %p1872_p6, 1, 0 }
   0xd   : > { %p1877_p8 = pnand %p1182_p5, %p163_p7  ;;  %s175_s28 = sshll.u32 %s1799_s27, 4  ;;  %s176_s28 = int_to_ptr.vmem [resolvable:$true] %s175_s28 }
   0xe   : > { %s1800_s30 = smov [#allocation7]   ;;  %s1641_s9 = scalar_lea.hbm %s2187_s1, 1024 }
   0xf   : > { %s2197_s26 = scalar_select %p1877_p8, 1, 0 }
  0x10   : > { %p1550_p9 = pneg %p1877_p8  ;;  %s191_s6 = sshll.u32 %s1800_s30, 4  ;;  %s1889_s6 = int_to_ptr.vmem [resolvable:$true] %s191_s6 }
  0x11   : > { %p1642_p11 = scmp.ne.s32.totalorder %s2187_s1, %s1641_s9  ;;  %p1648_p3 = scmp.lt.u32.totalorder %s1641_s9, %s2187_s1 }
  0x12   : > { %p1885_p10 = pnand %p1550_p9, %p2192_p1 }
  0x14   : > { %p1643_p12 = pneg %p1885_p10 }
  0x16   : > { %p1644_p13 = pnand %p1643_p12, %p1642_p11 }
  0x18   : > { %p1645_p0 = pneg %p1644_p13 }
  0x1a   : > { %p1650_p5 = pnand %p1648_p3, %p1645_p0 }
  0x1c   : > { %1653 = shalt.err (!%p1650_p5)
}
  0x1d   : > { %s1654_s14 = scalar_lea.vmem %s176_s28, 1024  ;;  %p1662_p2 = scmp.lt.s32.totalorder %s176_s28, %s176_s28 }
  0x1e   : > { %p1655_p7 = scmp.ne.s32.totalorder %s176_s28, %s1654_s14  ;;  %p1663_p6 = scmp.lt.s32.totalorder %s1654_s14, %s1654_s14 }
  0x20   : > { %p1657_p9 = pnand %p1655_p7, %p1643_p12  ;;  %p1664_p4 = por %p1663_p6, %p1662_p2 }
  0x22   : > { %p1658_p1 = pneg %p1657_p9 }
  0x24   : > { %p1665_p8 = pnand %p1664_p4, %p1658_p1 }
  0x26   : > { %1668 = shalt.err (!%p1665_p8)
}
  0x27   : > { %s1801_s15 = smov 64   ;;  %s1802_s16 = smov 4  }
  0x28   : > { %1553 = dma.hbm_to_vmem [thread:$0]  (!%p1885_p10), %s2187_s1, 1024, %s176_s28, [#allocation6], %s1801_s15, %s1801_s15, %s1802_s16  }
  0x29   : > { %s1669_s7 = scalar_lea.hbm %s2189_s3, 1024 }
  0x2a   : > { %p1670_p1 = scmp.ne.s32.totalorder %s2189_s3, %s1669_s7  ;;  %p1676_p6 = scmp.lt.u32.totalorder %s1669_s7, %s2189_s3 }
  0x2c   : > { %p1672_p2 = pnand %p1670_p1, %p1643_p12 }
  0x2e   : > { %p1673_p4 = pneg %p1672_p2 }
  0x30   : > { %p1678_p8 = pnand %p1676_p6, %p1673_p4 }
  0x32   : > { %1681 = shalt.err (!%p1678_p8)
}
  0x33   : > { %s1682_s28 = scalar_lea.vmem %s1889_s6, 1024  ;;  %p1690_p3 = scmp.lt.s32.totalorder %s1889_s6, %s1889_s6 }
  0x34   : > { %p1683_p11 = scmp.ne.s32.totalorder %s1889_s6, %s1682_s28  ;;  %p1691_p5 = scmp.lt.s32.totalorder %s1682_s28, %s1682_s28 }
  0x36   : > { %p1685_p13 = pnand %p1683_p11, %p1643_p12  ;;  %p1692_p7 = por %p1691_p5, %p1690_p3 }
  0x38   : > { %p1686_p0 = pneg %p1685_p13 }
  0x3a   : > { %p1693_p9 = pnand %p1692_p7, %p1686_p0 }
  0x3c   : > { %1696 = shalt.err (!%p1693_p9)
}
  0x3d   : > { %1556 = dma.hbm_to_vmem [thread:$0]  (!%p1885_p10), %s2189_s3, 1024, %s1889_s6, [#allocation6], %s1801_s15, %s1801_s15, %s1802_s16  }
  0x3e   : > { %s1945_s29 = sadd.s32 1, %s1797_s21   ;;  %s29_s14 = sadd.s32 1, %s1793_s20 }
  0x3f   : > { %s26_s17 = ssub.s32 %s1797_s21, %s1945_s29  ;;  %p36_p12 = scmp.ne.s32.totalorder %s1793_s20, %s1789_s19 }
  0x40   : > { %p27_p1 = scmp.eq.s32.totalorder %s26_s17, 0  ;;  %p37_p2 = scmp.eq.s32.totalorder %s1797_s21, 0 }
  0x41   : > { %p2199_p4 = scmp.eq.s32.totalorder %s1858_s22, 2  ;;  %p1567_p8 = scmp.lt.s32.totalorder %s1797_s21, 3 }
  0x42   : > { %s1961_s27 = scalar_select %p27_p1, %s1793_s20, %s29_s14  }
  0x43   : > { %p1955_p6 = por %p2199_p4, %p36_p12  ;;  %p38_p11 = por %p37_p2, %p36_p12 }
  0x44   : > { %s208_s30 = sand.u32 1, %s1793_s20   ;;  %s1265_s6 = sshll.u32 %s1797_s21, 11 }
  0x45   : > { %s1186_s7 = sshll.u32 %s208_s30, 7  ;;  %s1968_s10 = scalar_lea.hbm %s2186_s0, %s1265_s6 }
  0x46   : > { %s212_s11 = scalar_lea.vmem [#allocation2], %s1186_s7  ;;  %p1972_p10 = pnand %p1567_p8, %p38_p11 }
  0x47   : > { %s219_s28 = sshll.u32 %s212_s11, 4  ;;  %s1976_s13 = scalar_lea.sflag [#allocation3], %s208_s30  ;;  %s1970_s28 = int_to_ptr.vmem [resolvable:$true] %s219_s28 }
  0x48   : > { %s1697_s14 = scalar_lea.hbm %s1968_s10, 2048  ;;  %p1699_p0 = pneg %p1972_p10 }
  0x49   : > { %p1698_p13 = scmp.ne.s32.totalorder %s1968_s10, %s1697_s14  ;;  %s1702_s6 = scalar_lea.hbm %s2186_s0, 6144 }
  0x4a   : > { %p1703_p7 = scmp.lt.u32.totalorder %s1968_s10, %s2186_s0  ;;  %p1704_p9 = scmp.lt.u32.totalorder %s1702_s6, %s1697_s14 }
  0x4b   : > { %p1700_p3 = pnand %p1699_p0, %p1698_p13  ;;  %p1706_p1 = scmp.lt.u32.totalorder %s1697_s14, %s1968_s10 }
  0x4c   : > { %p1705_p12 = por %p1704_p9, %p1703_p7 }
  0x4d   : > { %p1701_p5 = pneg %p1700_p3 }
  0x4e   : > { %p1707_p2 = por %p1706_p1, %p1705_p12 }
  0x50   : > { %p1708_p4 = pnand %p1707_p2, %p1701_p5 }
  0x52   : > { %1711 = shalt.err (!%p1708_p4)
}
  0x53   : > { %s1712_s30 = scalar_lea.vmem %s1970_s28, 2048  ;;  %s1803_s11 = smov [#allocation2]  }
  0x54   : > { %p1713_p8 = scmp.ne.s32.totalorder %s1970_s28, %s1712_s30  ;;  %s1717_s17 = sshll.u32 %s1803_s11, 4  ;;  %s1718_s17 = int_to_ptr.vmem [resolvable:$false] %s1717_s17 }
  0x55   : > { %s1719_s7 = scalar_lea.vmem %s1718_s17, 4096  ;;  %p1720_p3 = scmp.lt.s32.totalorder %s1970_s28, %s1718_s17 }
  0x56   : > { %p1715_p11 = pnand %p1713_p8, %p1699_p0  ;;  %p1721_p7 = scmp.lt.s32.totalorder %s1719_s7, %s1712_s30 }
  0x58   : > { %p1716_p13 = pneg %p1715_p11  ;;  %p1722_p9 = por %p1721_p7, %p1720_p3 }
  0x5a   : > { %p1723_p12 = pnand %p1722_p9, %p1716_p13 }
  0x5c   : > { %1726 = shalt.err (!%p1723_p12)
}
  0x5d   : > { %1560 = dma.hbm_to_vmem [thread:$0]  (!%p1972_p10), %s1968_s10, 2048, %s1970_s28, %s1976_s13, %s1801_s15, %s1801_s15, %s1802_s16  }
  0x5e   : > { %p2202_p0 = scmp.ne.s32.totalorder %s2197_s26, 0 }
  0x5f   : > { %s2010_s14 = sand.u32 (!%p2202_p0), 1, %s1789_s19   ;;  %p2203_p5 = scmp.ne.s32.totalorder (!%p2202_p0), %s2195_s24, 0 }
  0x60   : > { %231 = sbr.rel (%p2202_p0) target bundleno = 652 (0x28c), region = 40  ;;  %s1190_s6 = sshll.u32 (!%p2202_p0), %s2010_s14, 7 }
  0x61   : > { %s234_s8 = scalar_lea.sflag (!%p2202_p0), [#allocation3], %s2010_s14  ;;  %s2016_s12 = scalar_lea.vmem (!%p2202_p0), [#allocation2], %s1190_s6 }
  0x67   : > { %1772 = dma.done.wait (%p2203_p5), %s234_s8, 2048  }
  0x68   : > { %1774 = vsyncadd (%p2203_p5), %s234_s8, 4294965248  ;;  %p2204_p10 = scmp.eq.s32.totalorder %s1858_s22, 0 }
  0x6a   : > { %1776 = dma.done.wait (%p2204_p10), [#allocation6], 2048   ;;  %p2205_p1 = pmov %p2204_p10 }
  0x6b   : > { %v1609_v0 = vld [vmem:[#allocation5] sm:$0xff]   ;;  %v1610_v1 = vld [vmem:[#allocation5 + $0x8] sm:$0xff]   ;;  %v1611_v2 = vld [vmem:[#allocation5 + $0x10] sm:$0xff]   ;;  %s2090_s10 = scalar_lea.vmem [#allocation8], %s1190_s6  ;;  %s1298_s28 = sshll.u32 %s1858_s22, 11 }
  0x6c   : > { %1778 = vsyncadd (%p2205_p1), [#allocation6], 4294965248  ;;  %1442 = vmatprep.subr.bf16.mxu0 %v1609_v0  ;;  %v1612_v3 = vld [vmem:[#allocation5 + $0x18] sm:$0xff]   ;;  %v1617_v4 = vld [vmem:[%s2016_s12] sm:$0xff]   ;;  %s1089_s13 = sshll.u32 %s2090_s10, 4  ;;  %s2139_s11 = scalar_lea.hbm %s2191_s5, %s1298_s28  ;;  %s2141_s13 = int_to_ptr.vmem [resolvable:$true] %s1089_s13 }
  0x6d   : > { %1443 = vmatpush3.bf16.msra.mxu0 %v1609_v0  ;;  %1458 = vmatprep.mubr.bf16.mxu0 %v1617_v4  ;;  %v1613_v5 = vld [vmem:[#allocation5 + $0x20] sm:$0xff]   ;;  %v1614_v6 = vld [vmem:[#allocation5 + $0x28] sm:$0xff]   ;;  %v1615_v7 = vld [vmem:[#allocation5 + $0x30] sm:$0xff]   ;;  %s1076_s22 = scalar_lea.sflag [#allocation4], %s2010_s14  ;;  %s1727_s17 = scalar_lea.vmem %s2141_s13, 2048 }
  0x6e   : > { %1444 = vmatprep.subr.bf16.mxu0 %v1610_v1  ;;  %v1616_v8 = vld [vmem:[#allocation5 + $0x38] sm:$0xff]   ;;  %v1633_v9 = vld [vmem:[#allocation7] sm:$0xff]   ;;  %v1634_v10 = vld [vmem:[#allocation7 + $0x8] sm:$0xff]   ;;  %p1728_p2 = scmp.ne.s32.totalorder %s2141_s13, %s1727_s17  ;;  %s1804_s7 = smov [#allocation8]  }
  0x6f   : > { %1490 = vmatprep.subr.bf16.mxu1 %v1633_v9  ;;  %v1635_v11 = vld [vmem:[#allocation7 + $0x10] sm:$0xff]   ;;  %v1618_v12 = vld [vmem:[%s2016_s12 + $0x8] sm:$0xff]   ;;  %v1636_v14 = vld [vmem:[#allocation7 + $0x18] sm:$0xff]   ;;  %s1731_s6 = sshll.u32 %s1804_s7, 4  ;;  %s1732_s6 = int_to_ptr.vmem [resolvable:$false] %s1731_s6 }
  0x70   : > { %1491 = vmatpush3.bf16.msra.mxu1 %v1633_v9  ;;  %v1619_v13 = vld [vmem:[%s2016_s12 + $0x10] sm:$0xff]   ;;  %v1637_v15 = vld [vmem:[#allocation7 + $0x20] sm:$0xff]   ;;  %v1620_v16 = vld [vmem:[%s2016_s12 + $0x18] sm:$0xff]   ;;  %p1729_p4 = pnand %p1728_p2, %p1955_p6  ;;  %s1733_s8 = scalar_lea.vmem %s1732_s6, 4096 }
  0x71   : > { %1445 = vmatpush3.bf16.msra.mxu0 %v1610_v1  ;;  %1492 = vmatprep.subr.bf16.mxu1 %v1634_v10  ;;  %v1621_v17 = vld [vmem:[%s2016_s12 + $0x20] sm:$0xff]   ;;  %v1638_v18 = vld [vmem:[#allocation7 + $0x28] sm:$0xff]   ;;  %v1623_v20 = vld [vmem:[%s2016_s12 + $0x30] sm:$0xff]   ;;  %p1734_p11 = scmp.lt.s32.totalorder %s2141_s13, %s1732_s6  ;;  %p1735_p13 = scmp.lt.s32.totalorder %s1733_s8, %s1727_s17 }
  0x72   : > { %1446 = vmatprep.subr.bf16.mxu0 %v1611_v2  ;;  %v1622_v19 = vld [vmem:[%s2016_s12 + $0x28] sm:$0xff]   ;;  %v1624_v21 = vld [vmem:[%s2016_s12 + $0x38] sm:$0xff]   ;;  %v1625_v22 = vld [vmem:[%s2016_s12 + $0x40] sm:$0xff]   ;;  %p1730_p8 = pneg %p1729_p4 }
  0x73   : > { %v1626_v23 = vld [vmem:[%s2016_s12 + $0x48] sm:$0xff]   ;;  %v1627_v24 = vld [vmem:[%s2016_s12 + $0x50] sm:$0xff]   ;;  %v1628_v25 = vld [vmem:[%s2016_s12 + $0x58] sm:$0xff]   ;;  %p1736_p3 = por %p1735_p13, %p1734_p11 }
  0x74   : > { %1493 = vmatpush3.bf16.msra.mxu1 %v1634_v10  ;;  %v1629_v26 = vld [vmem:[%s2016_s12 + $0x60] sm:$0xff]   ;;  %v1630_v27 = vld [vmem:[%s2016_s12 + $0x68] sm:$0xff]   ;;  %v1631_v28 = vld [vmem:[%s2016_s12 + $0x70] sm:$0xff]  }
  0x75   : > { %1447 = vmatpush3.bf16.msra.mxu0 %v1611_v2  ;;  %1494 = vmatprep.subr.bf16.mxu1 %v1635_v11  ;;  %v1632_v29 = vld [vmem:[%s2016_s12 + $0x78] sm:$0xff]   ;;  %v1639_v30 = vld [vmem:[#allocation7 + $0x30] sm:$0xff]   ;;  %v2045_v32 = vld [vmem:[%s2188_s2] ss:$0 sm:$0xff]  ;;  %p1737_p7 = pnand %p1736_p3, %p1730_p8 }
  0x76   : > { %1448 = vmatprep.subr.bf16.mxu0 %v1612_v3  ;;  %v1640_v31 = vld [vmem:[#allocation7 + $0x38] sm:$0xff]  }
  0x78   : > { %1495 = vmatpush3.bf16.msra.mxu1 %v1635_v11 }
  0x79   : > { %1449 = vmatpush3.bf16.msra.mxu0 %v1612_v3  ;;  %1496 = vmatprep.subr.bf16.mxu1 %v1636_v14 }
  0x7a   : > { %1450 = vmatprep.subr.bf16.mxu0 %v1613_v5 }
  0x7c   : > { %1497 = vmatpush3.bf16.msra.mxu1 %v1636_v14 }
  0x7d   : > { %1451 = vmatpush3.bf16.msra.mxu0 %v1613_v5  ;;  %1498 = vmatprep.subr.bf16.mxu1 %v1637_v15 }
  0x7e   : > { %1452 = vmatprep.subr.bf16.mxu0 %v1614_v6 }
  0x80   : > { %1499 = vmatpush3.bf16.msra.mxu1 %v1637_v15 }
  0x81   : > { %1453 = vmatpush3.bf16.msra.mxu0 %v1614_v6  ;;  %1500 = vmatprep.subr.bf16.mxu1 %v1638_v18 }
  0x82   : > { %1454 = vmatprep.subr.bf16.mxu0 %v1615_v7 }
  0x84   : > { %1501 = vmatpush3.bf16.msra.mxu1 %v1638_v18 }
  0x85   : > { %1455 = vmatpush3.bf16.msra.mxu0 %v1615_v7  ;;  %1502 = vmatprep.subr.bf16.mxu1 %v1639_v30 }
  0x86   : > { %1456 = vmatprep.subr.bf16.mxu0 %v1616_v8 }
  0x88   : > { %1503 = vmatpush3.bf16.msra.mxu1 %v1639_v30 }
  0x89   : > { %1457 = vmatpush3.bf16.msra.mxu0 %v1616_v8  ;;  %1504 = vmatprep.subr.bf16.mxu1 %v1640_v31 }
  0x8c   : > { %1459 = vmatmul.mubr.bf16.vlgmr.msra.gmra.mrb[0].mxu0 %v1618_v12  ;;  %1505 = vmatpush3.bf16.msra.mxu1 %v1640_v31 }
  0x8d   : > { %1462 = vmatprep.mubr.bf16.mxu0 %v1619_v13 }
  0x94   : > { %1463 = vmatmul.mubr.bf16.gmra.mrb[4].mxu0 %v1620_v16 }
  0x95   : > { %1466 = vmatprep.mubr.bf16.mxu0 %v1621_v17 }
  0x9c   : > { %1467 = vmatmul.mubr.bf16.gmra.mrb[8].mxu0 %v1622_v19 }
  0x9d   : > { %1470 = vmatprep.mubr.bf16.mxu0 %v1623_v20 }
  0xa4   : > { %1471 = vmatmul.mubr.bf16.gmra.mrb[12].mxu0 %v1624_v21 }
  0xa5   : > { %1474 = vmatprep.mubr.bf16.mxu0 %v1625_v22 }
  0xac   : > { %1475 = vmatmul.mubr.bf16.gmra.mrb[16].mxu0 %v1626_v23 }
  0xad   : > { %1478 = vmatprep.mubr.bf16.mxu0 %v1627_v24 }
  0xb4   : > { %1479 = vmatmul.mubr.bf16.gmra.mrb[20].mxu0 %v1628_v25 }
  0xb5   : > { %1482 = vmatprep.mubr.bf16.mxu0 %v1629_v26 }
  0xbc   : > { %1483 = vmatmul.mubr.bf16.gmra.mrb[24].mxu0 %v1630_v27 }
  0xbd   : > { %1486 = vmatprep.mubr.bf16.mxu0 %v1631_v28 }
  0xc4   : > { %1487 = vmatmul.mubr.bf16.gmra.mrb[28].mxu0 %v1632_v29 }
 0x15f   : > { %v1460_v33 = vpop.f32.mrb[0].mxu0 }
 0x160   : > { %v517_v34 = vadd.f32 %v1460_v33, %v2045_v32  ;;  %v508_v35 = vpop.f32.mrb[1].mxu0 }
 0x161   : > { %v509_v36 = vadd.f32 %v2045_v32, %v508_v35  ;;  %v1461_v37 = vpop.f32.mrb[2].mxu0 }
 0x162   : > { %v520_v38 = vadd.f32 %v1461_v37, %v2045_v32  ;;  %v511_v39 = vpop.f32.mrb[3].mxu0  ;;  %v637_v41 = vmax.f32 %v517_v34, 0.0 }
 0x163   : > { %v512_v40 = vadd.f32 %v2045_v32, %v511_v39  ;;  %v635_v43 = vmax.f32 %v509_v36, 0.0 }
 0x164   : > { %v638_v42 = vmax.f32 %v520_v38, 0.0 }
 0x165   : > { %v636_v44 = vmax.f32 %v512_v40, 0.0 }
 0x166   : > { %v668_v45 = vpack.c.bf16 %v638_v42, %v637_v41 }
 0x167   : > { %v1464_v46 = vpop.f32.mrb[4].mxu0  ;;  %v667_v47 = vpack.c.bf16 %v636_v44, %v635_v43 }
 0x168   : > { %v533_v48 = vadd.f32 %v1464_v46, %v2045_v32  ;;  %v524_v49 = vpop.f32.mrb[5].mxu0 }
 0x169   : > { %v525_v50 = vadd.f32 %v2045_v32, %v524_v49  ;;  %v1465_v51 = vpop.f32.mrb[6].mxu0  ;;  %1506 = vmatprep.mubr.bf16.mxu1 %v667_v47 }
 0x16a   : > { %v536_v52 = vadd.f32 %v1465_v51, %v2045_v32  ;;  %v527_v53 = vpop.f32.mrb[7].mxu0  ;;  %1507 = vmatmul.mubr.bf16.vlgmr.msra.gmra.mrb[0].mxu1 %v668_v45  ;;  %v641_v55 = vmax.f32 %v533_v48, 0.0 }
 0x16b   : > { %v528_v54 = vadd.f32 %v2045_v32, %v527_v53  ;;  %v639_v57 = vmax.f32 %v525_v50, 0.0 }
 0x16c   : > { %v642_v56 = vmax.f32 %v536_v52, 0.0 }
 0x16d   : > { %v640_v58 = vmax.f32 %v528_v54, 0.0 }
 0x16e   : > { %v670_v59 = vpack.c.bf16 %v642_v56, %v641_v55 }
 0x16f   : > { %v669_v60 = vpack.c.bf16 %v640_v58, %v639_v57  ;;  %v1468_v61 = vpop.f32.mrb[8].mxu0 }
 0x170   : > { %v549_v62 = vadd.f32 %v1468_v61, %v2045_v32  ;;  %v540_v63 = vpop.f32.mrb[9].mxu0 }
 0x171   : > { %v541_v0 = vadd.f32 %v2045_v32, %v540_v63  ;;  %v1469_v1 = vpop.f32.mrb[10].mxu0  ;;  %1510 = vmatprep.mubr.bf16.mxu1 %v669_v60 }
 0x172   : > { %v552_v2 = vadd.f32 %v1469_v1, %v2045_v32  ;;  %v543_v3 = vpop.f32.mrb[11].mxu0  ;;  %1511 = vmatmul.mubr.bf16.gmra.mrb[4].mxu1 %v670_v59  ;;  %v645_v5 = vmax.f32 %v549_v62, 0.0 }
 0x173   : > { %v544_v4 = vadd.f32 %v2045_v32, %v543_v3  ;;  %v643_v7 = vmax.f32 %v541_v0, 0.0 }
 0x174   : > { %v646_v6 = vmax.f32 %v552_v2, 0.0 }
 0x175   : > { %v644_v8 = vmax.f32 %v544_v4, 0.0 }
 0x176   : > { %v672_v9 = vpack.c.bf16 %v646_v6, %v645_v5 }
 0x177   : > { %v671_v10 = vpack.c.bf16 %v644_v8, %v643_v7  ;;  %v1472_v11 = vpop.f32.mrb[12].mxu0 }
 0x178   : > { %v565_v12 = vadd.f32 %v1472_v11, %v2045_v32  ;;  %v556_v13 = vpop.f32.mrb[13].mxu0 }
 0x179   : > { %v557_v14 = vadd.f32 %v2045_v32, %v556_v13  ;;  %v1473_v15 = vpop.f32.mrb[14].mxu0  ;;  %1514 = vmatprep.mubr.bf16.mxu1 %v671_v10 }
 0x17a   : > { %v568_v16 = vadd.f32 %v1473_v15, %v2045_v32  ;;  %v559_v17 = vpop.f32.mrb[15].mxu0  ;;  %1515 = vmatmul.mubr.bf16.gmra.mrb[8].mxu1 %v672_v9  ;;  %v649_v19 = vmax.f32 %v565_v12, 0.0 }
 0x17b   : > { %v560_v18 = vadd.f32 %v2045_v32, %v559_v17  ;;  %v647_v21 = vmax.f32 %v557_v14, 0.0 }
 0x17c   : > { %v650_v20 = vmax.f32 %v568_v16, 0.0 }
 0x17d   : > { %v648_v22 = vmax.f32 %v560_v18, 0.0 }
 0x17e   : > { %v674_v23 = vpack.c.bf16 %v650_v20, %v649_v19  ;;  %v2082_v19 = vld [vmem:[%s2190_s4] ss:$0 sm:$0xff] }
 0x17f   : > { %v673_v24 = vpack.c.bf16 %v648_v22, %v647_v21  ;;  %v1476_v25 = vpop.f32.mrb[16].mxu0 }
 0x180   : > { %v581_v26 = vadd.f32 %v1476_v25, %v2045_v32  ;;  %v572_v27 = vpop.f32.mrb[17].mxu0 }
 0x181   : > { %v573_v28 = vadd.f32 %v2045_v32, %v572_v27  ;;  %v1477_v29 = vpop.f32.mrb[18].mxu0  ;;  %1518 = vmatprep.mubr.bf16.mxu1 %v673_v24 }
 0x182   : > { %v584_v30 = vadd.f32 %v1477_v29, %v2045_v32  ;;  %v575_v31 = vpop.f32.mrb[19].mxu0  ;;  %1519 = vmatmul.mubr.bf16.gmra.mrb[12].mxu1 %v674_v23  ;;  %v653_v34 = vmax.f32 %v581_v26, 0.0 }
 0x183   : > { %v576_v33 = vadd.f32 %v2045_v32, %v575_v31  ;;  %v651_v36 = vmax.f32 %v573_v28, 0.0 }
 0x184   : > { %v654_v35 = vmax.f32 %v584_v30, 0.0 }
 0x185   : > { %v652_v37 = vmax.f32 %v576_v33, 0.0 }
 0x186   : > { %v676_v38 = vpack.c.bf16 %v654_v35, %v653_v34 }
 0x187   : > { %v675_v39 = vpack.c.bf16 %v652_v37, %v651_v36  ;;  %v1480_v40 = vpop.f32.mrb[20].mxu0 }
 0x188   : > { %v597_v41 = vadd.f32 %v1480_v40, %v2045_v32  ;;  %v588_v42 = vpop.f32.mrb[21].mxu0 }
 0x189   : > { %v589_v43 = vadd.f32 %v2045_v32, %v588_v42  ;;  %v1481_v44 = vpop.f32.mrb[22].mxu0  ;;  %1522 = vmatprep.mubr.bf16.mxu1 %v675_v39 }
 0x18a   : > { %v600_v45 = vadd.f32 %v1481_v44, %v2045_v32  ;;  %v591_v46 = vpop.f32.mrb[23].mxu0  ;;  %1523 = vmatmul.mubr.bf16.gmra.mrb[16].mxu1 %v676_v38  ;;  %v657_v48 = vmax.f32 %v597_v41, 0.0 }
 0x18b   : > { %v592_v47 = vadd.f32 %v2045_v32, %v591_v46  ;;  %v655_v50 = vmax.f32 %v589_v43, 0.0 }
 0x18c   : > { %v658_v49 = vmax.f32 %v600_v45, 0.0 }
 0x18d   : > { %v656_v51 = vmax.f32 %v592_v47, 0.0 }
 0x18e   : > { %v678_v52 = vpack.c.bf16 %v658_v49, %v657_v48 }
 0x18f   : > { %v677_v53 = vpack.c.bf16 %v656_v51, %v655_v50  ;;  %v1484_v54 = vpop.f32.mrb[24].mxu0 }
 0x190   : > { %v613_v55 = vadd.f32 %v1484_v54, %v2045_v32  ;;  %v604_v56 = vpop.f32.mrb[25].mxu0 }
 0x191   : > { %v605_v57 = vadd.f32 %v2045_v32, %v604_v56  ;;  %v1485_v58 = vpop.f32.mrb[26].mxu0  ;;  %1526 = vmatprep.mubr.bf16.mxu1 %v677_v53 }
 0x192   : > { %v616_v59 = vadd.f32 %v1485_v58, %v2045_v32  ;;  %v607_v60 = vpop.f32.mrb[27].mxu0  ;;  %1527 = vmatmul.mubr.bf16.gmra.mrb[20].mxu1 %v678_v52  ;;  %v661_v62 = vmax.f32 %v613_v55, 0.0 }
 0x193   : > { %v608_v61 = vadd.f32 %v2045_v32, %v607_v60  ;;  %v659_v0 = vmax.f32 %v605_v57, 0.0 }
 0x194   : > { %v662_v63 = vmax.f32 %v616_v59, 0.0 }
 0x195   : > { %v660_v1 = vmax.f32 %v608_v61, 0.0 }
 0x196   : > { %v680_v2 = vpack.c.bf16 %v662_v63, %v661_v62 }
 0x197   : > { %v679_v3 = vpack.c.bf16 %v660_v1, %v659_v0  ;;  %v1488_v4 = vpop.f32.mrb[28].mxu0 }
 0x198   : > { %v629_v5 = vadd.f32 %v1488_v4, %v2045_v32  ;;  %v620_v6 = vpop.f32.mrb[29].mxu0 }
 0x199   : > { %v621_v7 = vadd.f32 %v2045_v32, %v620_v6  ;;  %v1489_v8 = vpop.f32.mrb[30].mxu0  ;;  %1530 = vmatprep.mubr.bf16.mxu1 %v679_v3 }
 0x19a   : > { %v632_v9 = vadd.f32 %v1489_v8, %v2045_v32  ;;  %v623_v10 = vpop.f32.mrb[31].mxu0  ;;  %1531 = vmatmul.mubr.bf16.gmra.mrb[24].mxu1 %v680_v2  ;;  %v665_v12 = vmax.f32 %v629_v5, 0.0 }
 0x19b   : > { %v624_v11 = vadd.f32 %v2045_v32, %v623_v10  ;;  %v663_v14 = vmax.f32 %v621_v7, 0.0 }
 0x19c   : > { %v666_v13 = vmax.f32 %v632_v9, 0.0 }
 0x19d   : > { %v664_v15 = vmax.f32 %v624_v11, 0.0 }
 0x19e   : > { %v682_v16 = vpack.c.bf16 %v666_v13, %v665_v12 }
 0x19f   : > { %v681_v17 = vpack.c.bf16 %v664_v15, %v663_v14 }
 0x1a1   : > { %1534 = vmatprep.mubr.bf16.mxu1 %v681_v17 }
 0x1a2   : > { %1535 = vmatmul.mubr.bf16.gmra.mrb[28].mxu1 %v682_v16 }
 0x23d   : > { %v1508_v18 = vpop.f32.mrb[0].mxu1 }
 0x23e   : > { %v788_v20 = vpop.f32.mrb[1].mxu1  ;;  %v797_v22 = vadd.f32 %v1508_v18, %v2082_v19 }
 0x23f   : > { %v1509_v21 = vpop.f32.mrb[2].mxu1  ;;  %v789_v24 = vadd.f32 %v2082_v19, %v788_v20 }
 0x240   : > { %v800_v32 = vadd.f32 %v1509_v21, %v2082_v19  ;;  %v791_v23 = vpop.f32.mrb[3].mxu1 }
 0x241   : > { %v792_v25 = vadd.f32 %v2082_v19, %v791_v23 }
 0x242   : > { %v1307_v26 = vpack.c.bf16 %v800_v32, %v797_v22 }
 0x243   : > { %v1302_v27 = vpack.c.bf16 %v792_v25, %v789_v24 }
 0x244   : > { %1379 = vst [vmem:[%s2090_s10 + $0x8] sm:$0xff] %v1307_v26  }
 0x245   : > { %1303 = vst [vmem:[%s2090_s10] sm:$0xff] %v1302_v27   ;;  %v1512_v28 = vpop.f32.mrb[4].mxu1 }
 0x246   : > { %v804_v29 = vpop.f32.mrb[5].mxu1  ;;  %v813_v31 = vadd.f32 %v1512_v28, %v2082_v19 }
 0x247   : > { %v1513_v30 = vpop.f32.mrb[6].mxu1  ;;  %v805_v35 = vadd.f32 %v2082_v19, %v804_v29 }
 0x248   : > { %v816_v33 = vadd.f32 %v1513_v30, %v2082_v19  ;;  %v807_v34 = vpop.f32.mrb[7].mxu1 }
 0x249   : > { %v808_v36 = vadd.f32 %v2082_v19, %v807_v34 }
 0x24a   : > { %v1317_v37 = vpack.c.bf16 %v816_v33, %v813_v31 }
 0x24b   : > { %v1312_v38 = vpack.c.bf16 %v808_v36, %v805_v35 }
 0x24c   : > { %1381 = vst [vmem:[%s2090_s10 + $0x18] sm:$0xff] %v1317_v37  }
 0x24d   : > { %1380 = vst [vmem:[%s2090_s10 + $0x10] sm:$0xff] %v1312_v38   ;;  %v1516_v39 = vpop.f32.mrb[8].mxu1 }
 0x24e   : > { %v820_v40 = vpop.f32.mrb[9].mxu1  ;;  %v829_v42 = vadd.f32 %v1516_v39, %v2082_v19 }
 0x24f   : > { %v1517_v41 = vpop.f32.mrb[10].mxu1  ;;  %v821_v45 = vadd.f32 %v2082_v19, %v820_v40 }
 0x250   : > { %v832_v43 = vadd.f32 %v1517_v41, %v2082_v19  ;;  %v823_v44 = vpop.f32.mrb[11].mxu1 }
 0x251   : > { %v824_v46 = vadd.f32 %v2082_v19, %v823_v44 }
 0x252   : > { %v1327_v47 = vpack.c.bf16 %v832_v43, %v829_v42 }
 0x253   : > { %v1322_v48 = vpack.c.bf16 %v824_v46, %v821_v45 }
 0x254   : > { %1383 = vst [vmem:[%s2090_s10 + $0x28] sm:$0xff] %v1327_v47  }
 0x255   : > { %1382 = vst [vmem:[%s2090_s10 + $0x20] sm:$0xff] %v1322_v48   ;;  %v1520_v49 = vpop.f32.mrb[12].mxu1 }
 0x256   : > { %v836_v50 = vpop.f32.mrb[13].mxu1  ;;  %v845_v52 = vadd.f32 %v1520_v49, %v2082_v19 }
 0x257   : > { %v1521_v51 = vpop.f32.mrb[14].mxu1  ;;  %v837_v55 = vadd.f32 %v2082_v19, %v836_v50 }
 0x258   : > { %v848_v53 = vadd.f32 %v1521_v51, %v2082_v19  ;;  %v839_v54 = vpop.f32.mrb[15].mxu1 }
 0x259   : > { %v840_v56 = vadd.f32 %v2082_v19, %v839_v54 }
 0x25a   : > { %v1337_v57 = vpack.c.bf16 %v848_v53, %v845_v52 }
 0x25b   : > { %v1332_v58 = vpack.c.bf16 %v840_v56, %v837_v55 }
 0x25c   : > { %1385 = vst [vmem:[%s2090_s10 + $0x38] sm:$0xff] %v1337_v57  }
 0x25d   : > { %1384 = vst [vmem:[%s2090_s10 + $0x30] sm:$0xff] %v1332_v58   ;;  %v1524_v59 = vpop.f32.mrb[16].mxu1 }
 0x25e   : > { %v852_v60 = vpop.f32.mrb[17].mxu1  ;;  %v861_v62 = vadd.f32 %v1524_v59, %v2082_v19 }
 0x25f   : > { %v1525_v61 = vpop.f32.mrb[18].mxu1  ;;  %v853_v1 = vadd.f32 %v2082_v19, %v852_v60 }
 0x260   : > { %v864_v63 = vadd.f32 %v1525_v61, %v2082_v19  ;;  %v855_v0 = vpop.f32.mrb[19].mxu1 }
 0x261   : > { %v856_v2 = vadd.f32 %v2082_v19, %v855_v0 }
 0x262   : > { %v1347_v3 = vpack.c.bf16 %v864_v63, %v861_v62 }
 0x263   : > { %v1342_v4 = vpack.c.bf16 %v856_v2, %v853_v1 }
 0x264   : > { %1387 = vst [vmem:[%s2090_s10 + $0x48] sm:$0xff] %v1347_v3  }
 0x265   : > { %1386 = vst [vmem:[%s2090_s10 + $0x40] sm:$0xff] %v1342_v4   ;;  %v1528_v5 = vpop.f32.mrb[20].mxu1 }
 0x266   : > { %v868_v6 = vpop.f32.mrb[21].mxu1  ;;  %v877_v8 = vadd.f32 %v1528_v5, %v2082_v19 }
 0x267   : > { %v1529_v7 = vpop.f32.mrb[22].mxu1  ;;  %v869_v11 = vadd.f32 %v2082_v19, %v868_v6 }
 0x268   : > { %v880_v9 = vadd.f32 %v1529_v7, %v2082_v19  ;;  %v871_v10 = vpop.f32.mrb[23].mxu1 }
 0x269   : > { %v872_v12 = vadd.f32 %v2082_v19, %v871_v10 }
 0x26a   : > { %v1357_v13 = vpack.c.bf16 %v880_v9, %v877_v8 }
 0x26b   : > { %v1352_v14 = vpack.c.bf16 %v872_v12, %v869_v11 }
 0x26c   : > { %1389 = vst [vmem:[%s2090_s10 + $0x58] sm:$0xff] %v1357_v13  }
 0x26d   : > { %1388 = vst [vmem:[%s2090_s10 + $0x50] sm:$0xff] %v1352_v14   ;;  %v1532_v15 = vpop.f32.mrb[24].mxu1 }
 0x26e   : > { %v884_v16 = vpop.f32.mrb[25].mxu1  ;;  %v893_v18 = vadd.f32 %v1532_v15, %v2082_v19 }
 0x26f   : > { %v1533_v17 = vpop.f32.mrb[26].mxu1  ;;  %v885_v22 = vadd.f32 %v2082_v19, %v884_v16 }
 0x270   : > { %v896_v20 = vadd.f32 %v1533_v17, %v2082_v19  ;;  %v887_v21 = vpop.f32.mrb[27].mxu1 }
 0x271   : > { %v888_v32 = vadd.f32 %v2082_v19, %v887_v21 }
 0x272   : > { %v1367_v23 = vpack.c.bf16 %v896_v20, %v893_v18 }
 0x273   : > { %v1362_v24 = vpack.c.bf16 %v888_v32, %v885_v22 }
 0x274   : > { %1391 = vst [vmem:[%s2090_s10 + $0x68] sm:$0xff] %v1367_v23  }
 0x275   : > { %1390 = vst [vmem:[%s2090_s10 + $0x60] sm:$0xff] %v1362_v24   ;;  %v1536_v25 = vpop.f32.mrb[28].mxu1 }
 0x276   : > { %v900_v26 = vpop.f32.mrb[29].mxu1  ;;  %v909_v28 = vadd.f32 %v1536_v25, %v2082_v19 }
 0x277   : > { %v1537_v27 = vpop.f32.mrb[30].mxu1  ;;  %v901_v31 = vadd.f32 %v2082_v19, %v900_v26 }
 0x278   : > { %v912_v29 = vadd.f32 %v1537_v27, %v2082_v19  ;;  %v903_v30 = vpop.f32.mrb[31].mxu1 }
 0x279   : > { %v904_v33 = vadd.f32 %v2082_v19, %v903_v30 }
 0x27a   : > { %v1377_v34 = vpack.c.bf16 %v912_v29, %v909_v28 }
 0x27b   : > { %v1372_v35 = vpack.c.bf16 %v904_v33, %v901_v31 }
 0x27c   : > { %1393 = vst [vmem:[%s2090_s10 + $0x78] sm:$0xff] %v1377_v34  }
 0x27d   : > { %1392 = vst [vmem:[%s2090_s10 + $0x70] sm:$0xff] %v1372_v35  }
 0x27e   : > { %1740 = shalt.err (!%p1737_p7)
}
 0x27f   : > { %s1741_s12 = scalar_lea.hbm %s2139_s11, 2048  ;;  %s1745_s15 = scalar_lea.hbm %s2191_s5, 6144 }
 0x280   : > { %p1742_p9 = scmp.ne.s32.totalorder %s2139_s11, %s1741_s12  ;;  %p1746_p5 = scmp.lt.u32.totalorder %s2139_s11, %s2191_s5 }
 0x281   : > { %p1747_p10 = scmp.lt.u32.totalorder %s1745_s15, %s1741_s12  ;;  %p1749_p2 = scmp.lt.u32.totalorder %s1741_s12, %s2139_s11 }
 0x282   : > { %p1743_p12 = pnand %p1742_p9, %p1955_p6 }
 0x283   : > { %p1748_p1 = por %p1747_p10, %p1746_p5 }
 0x284   : > { %p1744_p0 = pneg %p1743_p12 }
 0x285   : > { %p1750_p4 = por %p1749_p2, %p1748_p1 }
 0x287   : > { %p1751_p8 = pnand %p1750_p4, %p1744_p0 }
 0x289   : > { %1754 = shalt.err (!%p1751_p8)
}
 0x28a   : > { %s1805_s28 = smov 64   ;;  %s1806_s9 = smov 4  }
 0x28b   : > { %1548 = dma.vmem_to_hbm [thread:$0]  (%p1955_p6), %s2141_s13, 2048, %s2139_s11, %s1076_s22, %s1805_s28, %s1805_s28, %s1806_s9  }
 0x28c PF: > { %p1570_p11 = scmp.ge.s32.totalorder %s1797_s21, 2  ;;  %s1104_s30 = sand.u32 1, %s1785_s18  }
 0x28d   : > { %p2206_p13 = scmp.ne.s32.totalorder %s2196_s25, 0  ;;  %s1105_s17 = scalar_lea.sflag [#allocation4], %s1104_s30 }
 0x28f   : > { %p1562_p3 = pnand %p1570_p11, %p2206_p13 }
 0x291   : > { %1780 = dma.done.wait (!%p1562_p3), %s1105_s17, 2048  }
 0x292   : > { %1782 = vsyncadd (!%p1562_p3), %s1105_s17, 4294965248  ;;  %p19_p7 = scmp.ge.s32.totalorder %s1945_s29, 5   ;;  %s2207_s18 = smov %s1789_s19 }
 0x293   : > { %s2208_s19 = smov %s1793_s20  ;;  %s2209_s20 = smov %s1961_s27 }
 0x294   : > { %s2210_s21 = smov %s1945_s29  ;;  %21 = sbr.rel (!%p19_p7) target bundleno = 6 (0x6), region = 93 }
 0x29b   :  { %1110 = vsyncpa [#allocation3], 1 }
 0x29c   :  { %1112 = vsyncpa [#allocation3 + $0x1], 1 }
 0x29d   :  { %1113 = vsyncpa [#allocation6], 1 }
 0x29e   :  { %1114 = vsyncpa [#allocation4], 1 }
 0x29f   :  { %1116 = vsyncpa [#allocation4 + $0x1], 1 }

</bundles_post_ra>
